<compile_context>
chip_gen: v7x
topology: tpu7x:2x2x1
jax: 0.10.0
libtpu: 0.0.40
codegen_flags: <defaults>
</compile_context>

<pallas_src>
import functools

import jax
import jax.numpy as jnp
from jax.experimental import pallas as pl
from jax.experimental.pallas import tpu as pltpu


def _round_up(x, m):
    return (x + m - 1) // m * m


def _ce_loss_kernel(pred_ref, gt_ref, out_ref, *, hw, chw):
    """One grid step == BLOCK_N images of the (padded) minibatch.

    pred_ref, gt_ref : (BLOCK_N, C*H*W) VMEM tiles
    out_ref          : (BLOCK_N, 128) VMEM tile; per-image contribution is
                       written (replicated across lanes) so the store is an
                       unmasked, lane-dense vst.
    """
    pred = pred_ref[...].astype(jnp.float32)
    gt = gt_ref[...].astype(jnp.float32)

    # Binary gt => exactly one of {-log(pred), -log(1-pred)} is live per element,
    # so one EUP push per element instead of two.
    pos_mask = gt == 1.0
    q = jnp.where(pos_mask, pred, 1.0 - pred)
    nll = -jnp.log(q)

    # Per-image counts over (C, H, W): pos = sum(gt) (binary), neg derived.
    pos_cnt = jnp.sum(gt, axis=-1, keepdims=True)          # (BLOCK_N, 1)
    neg_cnt = jnp.float32(chw) - pos_cnt                    # (BLOCK_N, 1)

    # Weighted NLL sums per image.
    pos_sum = jnp.sum(gt * nll, axis=-1, keepdims=True)     # (BLOCK_N, 1)
    neg_sum = jnp.sum((1.0 - gt) * nll, axis=-1, keepdims=True)

    hw_f = jnp.float32(hw)
    contrib = (hw_f / pos_cnt) * pos_sum + (hw_f / neg_cnt) * neg_sum  # (BLOCK_N, 1)

    out_ref[...] = jnp.broadcast_to(contrib, out_ref.shape)


def ce_loss_pallas(pred, gt, *, max_block_rows=1024,
                   vmem_budget_bytes=32 * 1024 * 1024):
    """pred, gt: (N, C, H, W); pred in (0, 1), gt binary {0, 1}."""
    assert pred.shape == gt.shape and pred.ndim == 4
    n, c, h, w = pred.shape
    hw = h * w            # torch.numel(pred[0][0])
    chw = c * h * w

    pred_f = pred.reshape(n, chw)
    gt_f = gt.reshape(n, chw)

    # Row-block: multiple of 8, big enough to amortize the ~0.35us/step pipeline
    # overhead, small enough that (2 inputs x 2 pipeline buffers) fits the
    # VMEM budget on every generation (v7x has only 64 MiB physical).
    bytes_per_row = 2 * 2 * chw * max(int(jnp.dtype(pred_f.dtype).itemsize), 4)
    rows_by_vmem = max(8, (vmem_budget_bytes // bytes_per_row) // 8 * 8)
    block_n = max(8, min(max_block_rows, _round_up(n, 8), rows_by_vmem))

    num_blocks = pl.cdiv(n, block_n)
    padded_n = num_blocks * block_n
    if padded_n != n:
        pad = padded_n - n
        # Padded rows are sliced off before the final sum; they only need to be
        # finite so nothing traps inside the kernel.
        pred_f = jnp.concatenate(
            [pred_f, jnp.full((pad, chw), 0.5, pred_f.dtype)], axis=0)
        gt_f = jnp.concatenate(
            [gt_f, jnp.zeros((pad, chw), gt_f.dtype)], axis=0)

    kernel = functools.partial(_ce_loss_kernel, hw=hw, chw=chw)

    partials = pl.pallas_call(
        kernel,
        out_shape=jax.ShapeDtypeStruct((padded_n, 128), jnp.float32),
        grid=(num_blocks,),
        in_specs=[
            pl.BlockSpec((block_n, chw), lambda i: (i, 0)),
            pl.BlockSpec((block_n, chw), lambda i: (i, 0)),
        ],
        out_specs=pl.BlockSpec((block_n, 128), lambda i: (i, 0)),
        compiler_params=pltpu.CompilerParams(
            dimension_semantics=("parallel",),       # disjoint output blocks
            vmem_limit_bytes=64 * 1024 * 1024,
        ),
    )(pred_f, gt_f)

    # Per-image contribution is replicated across the 128 lanes; take lane 0 of
    # the valid rows and reduce to the scalar loss in plain JAX.
    return jnp.sum(partials[:n, 0])


def ce_loss_ref(pred, gt):
    """Pure-JAX reference mirroring the PyTorch ce_loss exactly."""
    hw = pred.shape[2] * pred.shape[3]
    pos_inds = (gt == 1.0).astype(jnp.float32)
    neg_inds = (gt < 1.0).astype(jnp.float32)
    pos_weights = hw / jnp.sum(pos_inds, axis=(1, 2, 3))
    neg_weights = hw / jnp.sum(neg_inds, axis=(1, 2, 3))
    pos_loss = pos_weights[:, None, None, None] * (gt * -jnp.log(pred))
    neg_loss = neg_weights[:, None, None, None] * ((1.0 - gt) * -jnp.log(1.0 - pred))
    return pos_loss.sum() + neg_loss.sum()


if __name__ == "__main__":
    key = jax.random.PRNGKey(0)
    k_pred, k_gt = jax.random.split(key)

    N, C, H, W = 2, 4, 16, 16
    # pred must lie strictly in (0, 1) for the log terms -> use sigmoid.
    pred = jax.nn.sigmoid(jax.random.normal(k_pred, (N, C, H, W), jnp.float32))
    # binary ground-truth heat-map in {0, 1}
    gt = (jax.random.uniform(k_gt, (N, C, H, W)) > 0.9).astype(jnp.float32)
    # guarantee every image has at least one positive and one negative label
    # (otherwise both the reference and the original PyTorch loss are NaN).
    gt = gt.at[:, 0, 0, 0].set(1.0).at[:, 0, 0, 1].set(0.0)

    loss = jax.block_until_ready(ce_loss_pallas(pred, gt))
    ref = ce_loss_ref(pred, gt)
    assert jnp.allclose(loss, ref, rtol=1e-4, atol=1e-3), (loss, ref)

    print("KERNEL_OK")
</pallas_src>

<mosaic_0001>
module attributes {stable_mosaic.version = 11 : i64} {
  func.func @_ce_loss_kernel(%arg0: i32, %arg1: memref<8x1024xf32, #tpu.memory_space<vmem>>, %arg2: memref<8x1024xf32, #tpu.memory_space<vmem>>, %arg3: memref<8x128xf32, #tpu.memory_space<vmem>>) attributes {dimension_semantics = [#tpu.dimension_semantics<parallel>], iteration_bounds = array<i64: 1>, scalar_prefetch = 0 : i64, scratch_operands = 0 : i64, tpu.core_type = #tpu.core_type<tc>, window_params = [{transform_indices = @transform_0, window_bounds = array<i64: 8, 1024>}, {transform_indices = @transform_1, window_bounds = array<i64: 8, 1024>}, {transform_indices = @transform_2, window_bounds = array<i64: 8, 128>}]} {
    %c0 = arith.constant 0 : index
    %c0_0 = arith.constant 0 : index
    %0 = vector.load %arg1[%c0, %c0_0] : memref<8x1024xf32, #tpu.memory_space<vmem>>, vector<8x1024xf32>
    %c0_1 = arith.constant 0 : index
    %c0_2 = arith.constant 0 : index
    %1 = vector.load %arg2[%c0_1, %c0_2] : memref<8x1024xf32, #tpu.memory_space<vmem>>, vector<8x1024xf32>
    %cst = arith.constant 1.000000e+00 : f32
    %2 = vector.broadcast %cst : f32 to vector<8x1024xf32>
    %3 = arith.cmpf oeq, %1, %2 : vector<8x1024xf32>
    %cst_3 = arith.constant 1.000000e+00 : f32
    %4 = vector.broadcast %cst_3 : f32 to vector<8x1024xf32>
    %5 = arith.subf %4, %0 : vector<8x1024xf32>
    %6 = arith.select %3, %0, %5 : vector<8x1024xi1>, vector<8x1024xf32>
    %7 = math.log %6 : vector<8x1024xf32>
    %cst_4 = arith.constant 0.000000e+00 : f32
    %8 = vector.broadcast %cst_4 : f32 to vector<8x1024xf32>
    %9 = arith.subf %8, %7 : vector<8x1024xf32>
    %cst_5 = arith.constant dense<0.000000e+00> : vector<8xf32>
    %10 = vector.multi_reduction <add>, %1, %cst_5 [1] : vector<8x1024xf32> to vector<8xf32>
    %11 = vector.shape_cast %10 : vector<8xf32> to vector<8x1xf32>
    %cst_6 = arith.constant 1.024000e+03 : f32
    %12 = vector.broadcast %cst_6 : f32 to vector<8x1xf32>
    %13 = arith.subf %12, %11 : vector<8x1xf32>
    %14 = arith.mulf %1, %9 : vector<8x1024xf32>
    %cst_7 = arith.constant dense<0.000000e+00> : vector<8xf32>
    %15 = vector.multi_reduction <add>, %14, %cst_7 [1] : vector<8x1024xf32> to vector<8xf32>
    %16 = vector.shape_cast %15 : vector<8xf32> to vector<8x1xf32>
    %cst_8 = arith.constant 1.000000e+00 : f32
    %17 = vector.broadcast %cst_8 : f32 to vector<8x1024xf32>
    %18 = arith.subf %17, %1 : vector<8x1024xf32>
    %19 = arith.mulf %18, %9 : vector<8x1024xf32>
    %cst_9 = arith.constant dense<0.000000e+00> : vector<8xf32>
    %20 = vector.multi_reduction <add>, %19, %cst_9 [1] : vector<8x1024xf32> to vector<8xf32>
    %21 = vector.shape_cast %20 : vector<8xf32> to vector<8x1xf32>
    %cst_10 = arith.constant 2.560000e+02 : f32
    %22 = vector.broadcast %cst_10 : f32 to vector<8x1xf32>
    %23 = arith.divf %22, %11 : vector<8x1xf32>
    %24 = arith.mulf %23, %16 : vector<8x1xf32>
    %cst_11 = arith.constant 2.560000e+02 : f32
    %25 = vector.broadcast %cst_11 : f32 to vector<8x1xf32>
    %26 = arith.divf %25, %13 : vector<8x1xf32>
    %27 = arith.mulf %26, %21 : vector<8x1xf32>
    %28 = arith.addf %24, %27 : vector<8x1xf32>
    %29 = vector.shape_cast %28 : vector<8x1xf32> to vector<8x1xf32>
    %30 = vector.broadcast %29 : vector<8x1xf32> to vector<8x128xf32>
    %c0_12 = arith.constant 0 : index
    %c0_13 = arith.constant 0 : index
    %31 = vector.load %arg3[%c0_12, %c0_13] : memref<8x128xf32, #tpu.memory_space<vmem>>, vector<8x128xf32>
    tpu.vector_store %arg3[%c0_12, %c0_13], %30 {strides = array<i32>} : memref<8x128xf32, #tpu.memory_space<vmem>>, vector<8x128xf32>,
    return
  }
  func.func @transform_0(%arg0: i32) -> (i32, i32) {
    %c0_i32 = arith.constant 0 : i32
    %c0_i32_0 = arith.constant 0 : i32
    return %arg0, %c0_i32 : i32, i32
  }
  func.func @transform_1(%arg0: i32) -> (i32, i32) {
    %c0_i32 = arith.constant 0 : i32
    %c0_i32_0 = arith.constant 0 : i32
    return %arg0, %c0_i32 : i32, i32
  }
  func.func @transform_2(%arg0: i32) -> (i32, i32) {
    %c0_i32 = arith.constant 0 : i32
    %c0_i32_0 = arith.constant 0 : i32
    return %arg0, %c0_i32 : i32, i32
  }
}

</mosaic_0001>

<bundles_post_ra>
// kernel: tpu_custom_call.1
= control target key start
LH: loop header
LB: loop body
LE: loop exit
PB: predicated region body
PF: predicated region fallthrough
CT: control target
= control target key end

     0   :  { %7 = vsyncpa [#allocation3], 0  ;;  %s379_s0 = inlined_call_operand.hbm [shape: f32[8,1024], index: 0, kind: input, shape index: {}]   ;;  %s380_s1 = inlined_call_operand.hbm [shape: f32[8,1024], index: 1, kind: input, shape index: {}]   ;;  %s381_s2 = inlined_call_operand.hbm [shape: f32[8,128], index: 2, kind: output, shape index: {}]  }
   0x1   :  { %8 = vsyncpa [#allocation6], 0 }
   0x2   :  { %9 = vsyncpa [#allocation4], 0  ;;  %s271_s9 = smov [#allocation2]   ;;  %s272_s11 = smov [#allocation5]  }
   0x3   :  { %s16_s10 = sshll.u32 %s271_s9, 4  ;;  %s26_s12 = sshll.u32 %s272_s11, 4  ;;  %s17_s10 = int_to_ptr.vmem [resolvable:$true] %s16_s10  ;;  %s27_s12 = int_to_ptr.vmem [resolvable:$true] %s26_s12 }
   0x4   :  { %s199_s15 = scalar_lea.hbm %s379_s0, 1024 }
   0x5   :  { %p200_p0 = scmp.ne.s32.totalorder %s379_s0, %s199_s15  ;;  %p203_p1 = scmp.lt.u32.totalorder %s199_s15, %s379_s0 }
   0x7   :  { %p205_p2 = pnand %p203_p1, %p200_p0 }
   0x9   :  { %208 = shalt.err (!%p205_p2)
}
   0xa   :  { %s209_s20 = scalar_lea.vmem %s17_s10, 1024  ;;  %p214_p4 = scmp.lt.s32.totalorder %s17_s10, %s17_s10 }
   0xb   :  { %p210_p3 = scmp.ne.s32.totalorder %s17_s10, %s209_s20  ;;  %p215_p5 = scmp.lt.s32.totalorder %s209_s20, %s209_s20 }
   0xd   :  { %p216_p6 = por %p215_p5, %p214_p4 }
   0xf   :  { %p217_p7 = pnand %p216_p6, %p210_p3 }
  0x11   :  { %220 = shalt.err (!%p217_p7)
}
  0x12   :  { %19 = dma.hbm_to_vmem [thread:$0]  %s379_s0, 1024, %s17_s10, [#allocation3]  }
  0x13   :  { %s221_s25 = scalar_lea.hbm %s380_s1, 1024 }
  0x14   :  { %p222_p8 = scmp.ne.s32.totalorder %s380_s1, %s221_s25  ;;  %p225_p9 = scmp.lt.u32.totalorder %s221_s25, %s380_s1 }
  0x16   :  { %p227_p10 = pnand %p225_p9, %p222_p8 }
  0x18   :  { %230 = shalt.err (!%p227_p10)
}
  0x19   :  { %s231_s30 = scalar_lea.vmem %s27_s12, 1024  ;;  %p236_p12 = scmp.lt.s32.totalorder %s27_s12, %s27_s12 }
  0x1a   :  { %p232_p11 = scmp.ne.s32.totalorder %s27_s12, %s231_s30  ;;  %p237_p13 = scmp.lt.s32.totalorder %s231_s30, %s231_s30 }
  0x1c   :  { %p238_p0 = por %p237_p13, %p236_p12 }
  0x1e   :  { %p239_p1 = pnand %p238_p0, %p232_p11 }
  0x20   :  { %242 = shalt.err (!%p239_p1)
}
  0x21   :  { %29 = dma.hbm_to_vmem [thread:$0]  %s380_s1, 1024, %s27_s12, [#allocation6]  }
  0x22   :  { %265 = dma.done.wait [#allocation3], 1024  }
  0x23   :  { %266 = vsyncadd [#allocation3], 4294966272 }
  0x24   :  { %267 = dma.done.wait [#allocation6], 1024  }
  0x25   :  { %268 = vsyncadd [#allocation6], 4294966272  ;;  %v313_v0 = vld [vmem:[#allocation5] sm:$0xff]  ;;  %v315_v1 = vld [vmem:[#allocation5 + $0x8] sm:$0xff]  ;;  %s273_s1 = smov [#allocation7]  }
  0x26   :  { %v317_v2 = vld [vmem:[#allocation5 + $0x10] sm:$0xff]  ;;  %v319_v3 = vld [vmem:[#allocation5 + $0x18] sm:$0xff]  ;;  %v100_v4 = vadd.f32 %v315_v1, %v313_v0  ;;  %v323_v5 = vld [vmem:[#allocation5 + $0x20] sm:$0xff]  ;;  %vm53_vm0 = vcmp.eq.f32.partialorder %v315_v1, 1.0  ;;  %vm52_vm2 = vcmp.eq.f32.partialorder %v313_v0, 1.0  ;;  %v127_v42 = vsub.f32 1.0, %v313_v0 }
  0x27   :  { %v325_v6 = vld [vmem:[#allocation5 + $0x28] sm:$0xff]  ;;  %v36_v7 = vld [vmem:[#allocation2] sm:$0xff]  ;;  %vm54_vm1 = vcmp.eq.f32.partialorder %v317_v2, 1.0  ;;  %v38_v10 = vld [vmem:[#allocation2 + $0x10] sm:$0xff]  ;;  %vm55_vm3 = vcmp.eq.f32.partialorder %v319_v3, 1.0  ;;  %vm56_vm4 = vcmp.eq.f32.partialorder %v323_v5, 1.0 }
  0x28   :  { %v101_v8 = vadd.f32 %v100_v4, %v317_v2  ;;  %v37_v9 = vld [vmem:[#allocation2 + $0x8] sm:$0xff]  ;;  %v39_v11 = vld [vmem:[#allocation2 + $0x18] sm:$0xff]  ;;  %v60_v12 = vsub.f32 1.0, %v36_v7  ;;  %v40_v13 = vld [vmem:[#allocation2 + $0x20] sm:$0xff]  ;;  %v62_v17 = vsub.f32 1.0, %v38_v10  ;;  %vm57_vm5 = vcmp.eq.f32.partialorder %v325_v6, 1.0 }
  0x29   :  { %v41_v14 = vld [vmem:[#allocation2 + $0x28] sm:$0xff]  ;;  %v42_v15 = vld [vmem:[#allocation2 + $0x30] sm:$0xff]  ;;  %v61_v16 = vsub.f32 1.0, %v37_v9  ;;  %v63_v18 = vsub.f32 1.0, %v39_v11  ;;  %v43_v21 = vld [vmem:[#allocation2 + $0x38] sm:$0xff]  ;;  %v64_v22 = vsub.f32 1.0, %v40_v13 }
  0x2a   :  { %v331_v19 = vld [vmem:[#allocation5 + $0x30] sm:$0xff]  ;;  %v102_v20 = vadd.f32 %v101_v8, %v319_v3  ;;  %v335_v23 = vld [vmem:[#allocation5 + $0x38] sm:$0xff]  ;;  %v65_v24 = vsub.f32 1.0, %v41_v14  ;;  %v68_v25 = vsel %vm52_vm2, %v36_v7, %v60_v12  ;;  %v66_v28 = vsub.f32 1.0, %v42_v15  ;;  %s166_s4 = sshll.u32 %s273_s1, 4  ;;  %s167_s4 = int_to_ptr.vmem [resolvable:$true] %s166_s4 }
  0x2b   :  { %v69_v26 = vsel %vm53_vm0, %v37_v9, %v61_v16  ;;  %v70_v29 = vsel %vm54_vm1, %v38_v10, %v62_v17  ;;  %vm58_vm6 = vcmp.eq.f32.partialorder %v331_v19, 1.0  ;;  %v67_v30 = vsub.f32 1.0, %v43_v21  ;;  %s243_s5 = scalar_lea.vmem %s167_s4, 128  ;;  %p248_p3 = scmp.lt.s32.totalorder %s167_s4, %s167_s4 }
  0x2c   :  { %v103_v27 = vadd.f32 %v102_v20, %v323_v5  ;;  %v71_v31 = vsel %vm55_vm3, %v39_v11, %v63_v18  ;;  %179 = vlog2.f32 %v68_v25  ;;  %vm59_vm7 = vcmp.eq.f32.partialorder %v335_v23, 1.0  ;;  %p244_p2 = scmp.ne.s32.totalorder %s167_s4, %s243_s5  ;;  %p249_p4 = scmp.lt.s32.totalorder %s243_s5, %s243_s5 }
  0x2d   :  { %v72_v33 = vsel %vm56_vm4, %v40_v13, %v64_v22  ;;  %181 = vlog2.f32 %v69_v26  ;;  %v73_v34 = vsel %vm57_vm5, %v41_v14, %v65_v24  ;;  %v74_v36 = vsel %vm58_vm6, %v42_v15, %v66_v28 }
  0x2e   :  { %v104_v32 = vadd.f32 %v103_v27, %v325_v6  ;;  %183 = vlog2.f32 %v70_v29  ;;  %v75_v37 = vsel %vm59_vm7, %v43_v21, %v67_v30  ;;  %v128_v45 = vsub.f32 1.0, %v315_v1  ;;  %p250_p5 = por %p249_p4, %p248_p3 }
  0x2f   :  { %185 = vlog2.f32 %v71_v31  ;;  %v129_v49 = vsub.f32 1.0, %v317_v2  ;;  %v130_v53 = vsub.f32 1.0, %v319_v3  ;;  %v131_v54 = vsub.f32 1.0, %v323_v5 }
  0x30   :  { %v105_v35 = vadd.f32 %v104_v32, %v331_v19  ;;  %187 = vlog2.f32 %v72_v33  ;;  %v132_v58 = vsub.f32 1.0, %v325_v6  ;;  %v133_v18 = vsub.f32 1.0, %v331_v19  ;;  %p251_p6 = pnand %p250_p5, %p244_p2 }
  0x31   :  { %189 = vlog2.f32 %v73_v34  ;;  %v134_v25 = vsub.f32 1.0, %v335_v23 }
  0x32   :  { %v106_v38 = vadd.f32 %v105_v35, %v335_v23  ;;  %191 = vlog2.f32 %v74_v36 }
  0x33   :  { %193 = vlog2.f32 %v75_v37 }
  0x34   :  { %107 = vadd.xlane.f32.xlu0 %v106_v38 }
  0x36   :  { %v180_v39 = vpop.eup %179 }
  0x37   :  { %v182_v40 = vpop.eup %181  ;;  %v77_v41 = vmul.f32 0.6931472, %v180_v39 }
  0x38   :  { %v184_v43 = vpop.eup %183  ;;  %v79_v44 = vmul.f32 0.6931472, %v182_v40 }
  0x39   :  { %v186_v46 = vpop.eup %185  ;;  %v81_v47 = vmul.f32 0.6931472, %v184_v43  ;;  %v92_v48 = vsub.f32 0.0, %v77_v41 }
  0x3a   :  { %v188_v50 = vpop.eup %187  ;;  %v83_v51 = vmul.f32 0.6931472, %v186_v46  ;;  %v93_v52 = vsub.f32 0.0, %v79_v44 }
  0x3b   :  { %v190_v55 = vpop.eup %189  ;;  %v85_v56 = vmul.f32 0.6931472, %v188_v50  ;;  %v94_v57 = vsub.f32 0.0, %v81_v47  ;;  %v135_v59 = vmul.f32 %v127_v42, %v92_v48  ;;  %v110_v4 = vmul.f32 %v92_v48, %v313_v0 }
  0x3c   :  { %v192_v60 = vpop.eup %191  ;;  %v87_v61 = vmul.f32 0.6931472, %v190_v55  ;;  %v95_v62 = vsub.f32 0.0, %v83_v51  ;;  %v136_v63 = vmul.f32 %v128_v45, %v93_v52  ;;  %v111_v11 = vmul.f32 %v93_v52, %v315_v1 }
  0x3d   :  { %v194_v7 = vpop.eup %193  ;;  %v89_v8 = vmul.f32 0.6931472, %v192_v60  ;;  %v96_v9 = vsub.f32 0.0, %v85_v56  ;;  %v137_v10 = vmul.f32 %v129_v49, %v94_v57  ;;  %v112_v16 = vmul.f32 %v94_v57, %v317_v2 }
  0x3e   :  { %v91_v12 = vmul.f32 0.6931472, %v194_v7  ;;  %v97_v13 = vsub.f32 0.0, %v87_v61  ;;  %v138_v14 = vmul.f32 %v130_v53, %v95_v62  ;;  %v143_v15 = vadd.f32 %v136_v63, %v135_v59 }
  0x3f   :  { %v98_v17 = vsub.f32 0.0, %v89_v8  ;;  %v139_v20 = vmul.f32 %v131_v54, %v96_v9  ;;  %v113_v22 = vmul.f32 %v95_v62, %v319_v3  ;;  %v118_v0 = vadd.f32 %v111_v11, %v110_v4 }
  0x40   :  { %v144_v21 = vadd.f32 %v143_v15, %v137_v10  ;;  %v99_v24 = vsub.f32 0.0, %v91_v12  ;;  %v140_v26 = vmul.f32 %v132_v58, %v97_v13  ;;  %v114_v1 = vmul.f32 %v96_v9, %v323_v5 }
  0x41   :  { %v119_v28 = vadd.f32 %v118_v0, %v112_v16  ;;  %v141_v29 = vmul.f32 %v133_v18, %v98_v17  ;;  %v115_v2 = vmul.f32 %v97_v13, %v325_v6  ;;  %v116_v34 = vmul.f32 %v98_v17, %v331_v19 }
  0x42   :  { %v145_v27 = vadd.f32 %v144_v21, %v138_v14  ;;  %v142_v32 = vmul.f32 %v134_v25, %v99_v24  ;;  %v117_v36 = vmul.f32 %v99_v24, %v335_v23 }
  0x43   :  { %v120_v31 = vadd.f32 %v119_v28, %v113_v22 }
  0x44   :  { %v146_v30 = vadd.f32 %v145_v27, %v139_v20 }
  0x45   :  { %v121_v35 = vadd.f32 %v120_v31, %v114_v1 }
  0x46   :  { %v147_v33 = vadd.f32 %v146_v30, %v140_v26 }
  0x47   :  { %v122_v37 = vadd.f32 %v121_v35, %v115_v2 }
  0x48   :  { %v148_v3 = vadd.f32 %v147_v33, %v141_v29 }
  0x49   :  { %v123_v39 = vadd.f32 %v122_v37, %v116_v34 }
  0x4a   :  { %v149_v38 = vadd.f32 %v148_v3, %v142_v32 }
  0x4b   :  { %v124_v40 = vadd.f32 %v123_v39, %v117_v36 }
  0x4c   :  { %150 = vadd.xlane.f32.xlu1 %v149_v38 }
  0x4d   :  { %125 = vadd.xlane.f32.xlu0 %v124_v40 }
  0xc1   :  { %v108_v5 = vpop.xlane.xlu0 %107 }
  0xc2   :  { %v109_v41 = vsub.f32 1024.0, %v108_v5 }
  0xc4   :  { %195 = vrcp.f32 %v109_v41 }
  0xc5   :  { %197 = vrcp.f32 %v108_v5 }
  0xce   :  { %v196_v6 = vpop.eup %195 }
  0xcf   :  { %v156_v42 = vmul.f32 256.0, %v196_v6  ;;  %v198_v43 = vpop.eup %197 }
  0xd0   :  { %v153_v19 = vmul.f32 256.0, %v198_v43 }
  0xd9   :  { %v151_v44 = vpop.xlane.xlu1 %150 }
  0xda   :  { %v157_v45 = vmul.f32 %v156_v42, %v151_v44  ;;  %v126_v46 = vpop.xlane.xlu0 %125 }
  0xdb   :  { %v154_v23 = vmul.f32 %v153_v19, %v126_v46 }
  0xdd   :  { %v158_v47 = vadd.f32 %v157_v45, %v154_v23 }
  0xdf   :  { %159 = vst [vmem:[#allocation7] sm:$0xff] %v158_v47 }
  0xe0   :  { %254 = shalt.err (!%p251_p6)
}
  0xe1   :  { %s255_s8 = scalar_lea.hbm %s381_s2, 128 }
  0xe2   :  { %p256_p7 = scmp.ne.s32.totalorder %s381_s2, %s255_s8  ;;  %p259_p8 = scmp.lt.u32.totalorder %s255_s8, %s381_s2 }
  0xe4   :  { %p261_p9 = pnand %p259_p8, %p256_p7 }
  0xe6   :  { %264 = shalt.err (!%p261_p9)
}
  0xe7   :  { %169 = dma.vmem_to_hbm [thread:$0]  %s167_s4, 128, %s381_s2, [#allocation4]  }
  0xe8   :  { %269 = dma.done.wait [#allocation4], 128  }
  0xe9   :  { %270 = vsyncadd [#allocation4], 4294967168 }
  0xea   :  { %173 = vsyncpa [#allocation3], 1 }
  0xeb   :  { %174 = vsyncpa [#allocation6], 1 }
  0xec   :  { %175 = vsyncpa [#allocation4], 1 }

</bundles_post_ra>
